<compile_context>
chip_gen: v7x
topology: tpu7x:2x2x1
jax: 0.10.0
libtpu: 0.0.40
codegen_flags: <defaults>
</compile_context>

<pallas_src>
import jax
import jax.numpy as jnp
from jax.experimental import pallas as pl
from jax.experimental.pallas import tpu as pltpu

_SUBLANES = 8  # f32 sublane granularity (second-to-last dim)


def _round_up(x, m):
    return ((x + m - 1) // m) * m


def _make_mlp_kernel(n_feature: int):
    """Fused MLP body: relu(x @ W1 + b1) @ W2 + b2."""
    use_vpu_layer1 = n_feature <= 8  # K=2 contraction would waste >98% of the MXU

    def mlp_kernel(x_ref, w1_ref, b1_ref, w2_ref, b2_ref, o_ref):
        x = x_ref[...]        # (TB, F)  f32
        w1 = w1_ref[...]      # (F, H)
        b1 = b1_ref[...]      # (1, H)

        if use_vpu_layer1:
            # Layer 1 as F broadcast FMAs on the VPU, unrolled at trace time.
            h = x[:, 0:1] * w1[0:1, :]
            for f in range(1, n_feature):
                h = h + x[:, f:f + 1] * w1[f:f + 1, :]
            h = h + b1
        else:
            h = jnp.dot(x, w1, preferred_element_type=jnp.float32) + b1

        h = jnp.maximum(h, 0.0)  # ReLU (VPU)

        # Layer 2 on the MXU; narrow (tb, O) store — masked lanes are fine,
        # HBM writeback is only the real O columns.
        y = jnp.dot(h, w2_ref[...], preferred_element_type=jnp.float32)
        y = y + b2_ref[...]
        o_ref[...] = y.astype(o_ref.dtype)

    return mlp_kernel


def net_forward(x, w1, b1, w2, b2, *, batch_tile=4096):
    """x: (B, F) f32; w1: (F, H); b1: (1, H); w2: (H, O); b2: (1, O) -> (B, O) f32."""
    B, F = x.shape
    H = w1.shape[1]
    O = w2.shape[1]

    kernel = _make_mlp_kernel(F)

    # True cost of the fused op (helps XLA schedule/overlap neighbours).
    cost = pl.CostEstimate(
        flops=2 * B * H * (F + O) + B * H,
        transcendentals=0,
        bytes_accessed=4 * (B * F + B * O + F * H + H + H * O + O),
    )

    if B <= 512:
        # Tiny problem: skip the grid / pipeline machinery entirely.
        # Whole arrays live in VMEM; single kernel invocation; no padding.
        return pl.pallas_call(
            kernel,
            out_shape=jax.ShapeDtypeStruct((B, O), jnp.float32),
            in_specs=[pl.BlockSpec(memory_space=pltpu.MemorySpace.VMEM)] * 5,
            out_specs=pl.BlockSpec(memory_space=pltpu.MemorySpace.VMEM),
            cost_estimate=cost,
        )(x, w1, b1, w2, b2)

    # Balanced batch tiling: >= 2 tiles (even count) so v7x's two TensorCores
    # split the batch axis evenly; tb is a multiple of 8 (f32 sublane).
    num_tiles = max(2, pl.cdiv(B, batch_tile))
    if num_tiles % 2:
        num_tiles += 1
    tb = _round_up(pl.cdiv(B, num_tiles), _SUBLANES)
    num_tiles = pl.cdiv(B, tb)

    # Only the batch axis is gridded; weights/biases stay resident (index_map
    # pinned at block (0, 0)). The last block may be ragged (< 8 extra rows):
    # its OOB input rows read unspecified data and the corresponding output
    # rows are masked on writeback — they never appear in the (B, O) result.
    return pl.pallas_call(
        kernel,
        out_shape=jax.ShapeDtypeStruct((B, O), jnp.float32),
        grid=(num_tiles,),
        in_specs=[
            pl.BlockSpec((tb, F), lambda i: (i, 0)),
            pl.BlockSpec((F, H), lambda i: (0, 0)),
            pl.BlockSpec((1, H), lambda i: (0, 0)),
            pl.BlockSpec((H, O), lambda i: (0, 0)),
            pl.BlockSpec((1, O), lambda i: (0, 0)),
        ],
        out_specs=pl.BlockSpec((tb, O), lambda i: (i, 0)),
        compiler_params=pltpu.CompilerParams(
            dimension_semantics=("parallel",),
            vmem_limit_bytes=32 * 1024 * 1024,
        ),
        cost_estimate=cost,
    )(x, w1, b1, w2, b2)


def init_params(key, n_feature, n_hidden, n_output):
    # Deterministic init mimicking torch.nn.Linear's U(-1/sqrt(fan_in), ...).
    k1, k2, k3, k4 = jax.random.split(key, 4)
    lim1 = 1.0 / jnp.sqrt(jnp.float32(n_feature))
    lim2 = 1.0 / jnp.sqrt(jnp.float32(n_hidden))
    w1 = jax.random.uniform(k1, (n_feature, n_hidden), jnp.float32, -lim1, lim1)
    b1 = jax.random.uniform(k2, (1, n_hidden), jnp.float32, -lim1, lim1)
    w2 = jax.random.uniform(k3, (n_hidden, n_output), jnp.float32, -lim2, lim2)
    b2 = jax.random.uniform(k4, (1, n_output), jnp.float32, -lim2, lim2)
    return w1, b1, w2, b2


def _ref(x, w1, b1, w2, b2):
    return jnp.maximum(x @ w1 + b1, 0.0) @ w2 + b2


if __name__ == "__main__":
    # Shapes implied by the classification test: 2 input features, 2 classes.
    batch, n_feature, n_hidden, n_output = 16, 2, 32, 2

    key = jax.random.PRNGKey(0)
    kx, kp = jax.random.split(key)

    # Synthetic two-blob data like the torch script: half around +2, half around -2.
    half = batch // 2
    x0 = 2.0 + jax.random.normal(kx, (half, n_feature), jnp.float32)
    x1 = -2.0 + jax.random.normal(jax.random.fold_in(kx, 1),
                                  (batch - half, n_feature), jnp.float32)
    x = jnp.concatenate([x0, x1], axis=0)

    w1, b1, w2, b2 = init_params(kp, n_feature, n_hidden, n_output)

    # Small (grid-less, fully VMEM-resident) path.
    out = net_forward(x, w1, b1, w2, b2)
    jax.block_until_ready(out)
    assert out.shape == (batch, n_output)
    assert jnp.allclose(out, _ref(x, w1, b1, w2, b2), atol=1e-4, rtol=1e-4)

    # Batch-tiled path with a non-multiple batch (exercises the ragged last block
    # and the balanced 2-tile split).
    big_batch = 3000
    xb = jax.random.normal(jax.random.fold_in(kx, 2),
                           (big_batch, n_feature), jnp.float32) * 2.0
    out_b = net_forward(xb, w1, b1, w2, b2, batch_tile=4096)
    jax.block_until_ready(out_b)
    assert out_b.shape == (big_batch, n_output)
    assert jnp.allclose(out_b, _ref(xb, w1, b1, w2, b2), atol=1e-4, rtol=1e-4)

    print("KERNEL_OK")
</pallas_src>

<mosaic_0001>
module attributes {stable_mosaic.version = 11 : i64} {
  func.func @mlp_kernel(%arg0: memref<16x2xf32, #tpu.memory_space<vmem>>, %arg1: memref<2x32xf32, #tpu.memory_space<vmem>>, %arg2: memref<1x32xf32, #tpu.memory_space<vmem>>, %arg3: memref<32x2xf32, #tpu.memory_space<vmem>>, %arg4: memref<1x2xf32, #tpu.memory_space<vmem>>, %arg5: memref<16x2xf32, #tpu.memory_space<vmem>>) attributes {dimension_semantics = [], scalar_prefetch = 0 : i64, scratch_operands = 0 : i64, tpu.core_type = #tpu.core_type<tc>} {
    %c0 = arith.constant 0 : index
    %c0_0 = arith.constant 0 : index
    %0 = vector.load %arg0[%c0, %c0_0] : memref<16x2xf32, #tpu.memory_space<vmem>>, vector<16x2xf32>
    %c0_1 = arith.constant 0 : index
    %c0_2 = arith.constant 0 : index
    %1 = vector.load %arg1[%c0_1, %c0_2] : memref<2x32xf32, #tpu.memory_space<vmem>>, vector<2x32xf32>
    %c0_3 = arith.constant 0 : index
    %c0_4 = arith.constant 0 : index
    %2 = vector.load %arg2[%c0_3, %c0_4] : memref<1x32xf32, #tpu.memory_space<vmem>>, vector<1x32xf32>
    %3 = vector.extract_strided_slice %0 {offsets = [0, 0], sizes = [16, 1], strides = [1, 1]} : vector<16x2xf32> to vector<16x1xf32>
    %4 = vector.extract_strided_slice %1 {offsets = [0, 0], sizes = [1, 32], strides = [1, 1]} : vector<2x32xf32> to vector<1x32xf32>
    %5 = vector.broadcast %3 : vector<16x1xf32> to vector<16x32xf32>
    %6 = vector.broadcast %4 : vector<1x32xf32> to vector<16x32xf32>
    %7 = arith.mulf %5, %6 : vector<16x32xf32>
    %8 = vector.extract_strided_slice %0 {offsets = [0, 1], sizes = [16, 1], strides = [1, 1]} : vector<16x2xf32> to vector<16x1xf32>
    %9 = vector.extract_strided_slice %1 {offsets = [1, 0], sizes = [1, 32], strides = [1, 1]} : vector<2x32xf32> to vector<1x32xf32>
    %10 = vector.broadcast %8 : vector<16x1xf32> to vector<16x32xf32>
    %11 = vector.broadcast %9 : vector<1x32xf32> to vector<16x32xf32>
    %12 = arith.mulf %10, %11 : vector<16x32xf32>
    %13 = arith.addf %7, %12 : vector<16x32xf32>
    %14 = vector.broadcast %2 : vector<1x32xf32> to vector<16x32xf32>
    %15 = arith.addf %13, %14 : vector<16x32xf32>
    %cst = arith.constant 0.000000e+00 : f32
    %16 = vector.broadcast %cst : f32 to vector<16x32xf32>
    %17 = arith.maximumf %15, %16 : vector<16x32xf32>
    %c0_5 = arith.constant 0 : index
    %c0_6 = arith.constant 0 : index
    %18 = vector.load %arg3[%c0_5, %c0_6] : memref<32x2xf32, #tpu.memory_space<vmem>>, vector<32x2xf32>
    %cst_7 = arith.constant dense<0.000000e+00> : vector<16x2xf32>
    %19 = tpu.matmul %17, %18, %cst_7 {dimension_numbers = #tpu.dot_dimension_numbers<[1], [0], [0], [1], [0, 0, 1, 1], [], []>} : vector<16x32xf32>, vector<32x2xf32>, vector<16x2xf32> -> vector<16x2xf32>
    %c0_8 = arith.constant 0 : index
    %c0_9 = arith.constant 0 : index
    %20 = vector.load %arg4[%c0_8, %c0_9] : memref<1x2xf32, #tpu.memory_space<vmem>>, vector<1x2xf32>
    %21 = vector.broadcast %20 : vector<1x2xf32> to vector<16x2xf32>
    %22 = arith.addf %19, %21 : vector<16x2xf32>
    %c0_10 = arith.constant 0 : index
    %c0_11 = arith.constant 0 : index
    %23 = vector.load %arg5[%c0_10, %c0_11] : memref<16x2xf32, #tpu.memory_space<vmem>>, vector<16x2xf32>
    tpu.vector_store %arg5[%c0_10, %c0_11], %22 {strides = array<i32>} : memref<16x2xf32, #tpu.memory_space<vmem>>, vector<16x2xf32>,
    return
  }
}

</mosaic_0001>

<bundles_post_ra>
// kernel: tpu_custom_call.1
= control target key start
LH: loop header
LB: loop body
LE: loop exit
PB: predicated region body
PF: predicated region fallthrough
CT: control target
= control target key end

     0   :  { %v201_v0 = vmov 0   ;;  %v202_v5 = vmov 1   ;;  %v34_v10 = vlaneseq  ;;  %vm77_vm0 = vcmask 261120   ;;  %s266_s0 = inlined_call_operand.vmem [shape: f32[16,2], index: 0, kind: input, shape index: {}]   ;;  %s267_s3 = inlined_call_operand.vmem [shape: f32[32,2], index: 3, kind: input, shape index: {}]   ;;  %s268_s1 = inlined_call_operand.vmem [shape: f32[2,32], index: 1, kind: input, shape index: {}]   ;;  %s269_s2 = inlined_call_operand.vmem [shape: f32[1,32], index: 2, kind: input, shape index: {}]   ;;  %s270_s4 = inlined_call_operand.vmem [shape: f32[1,2], index: 4, kind: input, shape index: {}]   ;;  %s271_s5 = inlined_call_operand.vmem [shape: f32[16,2], index: 5, kind: output, shape index: {}]  }
   0x1   :  { %199 = vset.pattern.permute.xlu1 %v201_v0  ;;  %197 = vset.pattern.permute.xlu0 %v201_v0  ;;  %v21_v1 = vld [vmem:[%s266_s0 + $0x8] sm:$0xff]  ;;  %v20_v2 = vld [vmem:[%s266_s0] sm:$0xff]  ;;  %v68_v7 = vld [vmem:[%s267_s3 + $0x10] sm:$0xff]  ;;  %vm159_vm1 = vcmask 15360  }
   0x2   :  { %31 = vperm.xlu1 %199, %v21_v1   ;;  %26 = vperm.xlu0 %197, %v20_v2   ;;  %v66_v3 = vld [vmem:[%s267_s3] sm:$0xff]  ;;  %v67_v4 = vld [vmem:[%s267_s3 + $0x8] sm:$0xff]  ;;  %v69_v8 = vld [vmem:[%s267_s3 + $0x18] sm:$0xff]  ;;  %v35_v11 = vshrl.u32 %v34_v10, 7 }
   0x3   :  { %v187_v6 = vpack.c.bf16 %v67_v4, %v66_v3  ;;  %v191_v9 = vpack.c.bf16 %v69_v8, %v68_v7  ;;  %v22_v14 = vld [vmem:[%s268_s1] sm:$0x3] }
   0x4   :  { %v36_v12 = vsub.s32 0, %v35_v11  ;;  %v50_v13 = vsub.s32 1, %v35_v11  ;;  %v166_v25 = vld [vmem:[%s269_s2] ss:$0 sm:$0xff] }
   0x5   :  { %188 = vmatprep.subr.bf16.mxu0 %v187_v6  ;;  %v167_v32 = vld [vmem:[%s270_s4] ss:$0 sm:$0xff] }
   0x6   :  { %200 = vset.pattern.permute.xlu1 %v202_v5  ;;  %198 = vset.pattern.permute.xlu0 %v202_v5  ;;  %v37_v17 = vrot.slane %v22_v14, %v36_v12  ;;  %v51_v18 = vrot.slane %v22_v14, %v50_v13 }
   0x7   :  { %45 = vperm.xlu1 %200, %v21_v1   ;;  %41 = vperm.xlu0 %198, %v20_v2  }
   0x8   :  { %190 = vmatpush3.bf16.msra.mxu0 %v187_v6 }
   0x9   :  { %192 = vmatprep.subr.bf16.mxu0 %v191_v9 }
   0xc   :  { %194 = vmatpush3.bf16.msra.mxu0 %v191_v9 }
  0x81   :  { %v27_v15 = vpop.permute.xlu0 %26  ;;  %v32_v16 = vpop.permute.xlu1 %31 }
  0x82   :  { %v38_v21 = vmul.f32 %v37_v17, %v27_v15  ;;  %v39_v22 = vmul.f32 %v37_v17, %v32_v16 }
  0x86   :  { %v46_v19 = vpop.permute.xlu1 %45  ;;  %v42_v20 = vpop.permute.xlu0 %41 }
  0x87   :  { %v53_v23 = vmul.f32 %v51_v18, %v46_v19  ;;  %v52_v24 = vmul.f32 %v51_v18, %v42_v20 }
  0x89   :  { %v55_v26 = vadd.f32 %v53_v23, %v39_v22  ;;  %v54_v27 = vadd.f32 %v52_v24, %v38_v21 }
  0x8b   :  { %v62_v28 = vadd.f32 %v166_v25, %v54_v27  ;;  %v63_v29 = vadd.f32 %v166_v25, %v55_v26 }
  0x8d   :  { %v64_v30 = vmax.f32 %v62_v28, 0.0  ;;  %v65_v31 = vmax.f32 %v63_v29, 0.0 }
  0x8f   :  { %184 = vmatprep.mubr.msk.f32.mxu0 %vm77_vm0, %v64_v30 }
  0x90   :  { %185 = vmatmul.mubr.msk.f32.vlgmr.msra.gmra.mrb[0].mxu0 %vm77_vm0, %v65_v31 }
 0x163   :  { %v186_v33 = vpop.f32.mrb[0].mxu0 }
 0x164   :  { %v156_v34 = vadd.f32 %v186_v33, %v167_v32  ;;  %v150_v35 = vpop.f32.mrb[1].mxu0 }
 0x165   :  { %v151_v36 = vadd.f32 %v167_v32, %v150_v35 }
 0x166   :  { %161 = vst.msk [vmem:[%s271_s5 + $0x8] sm:$0xff] %vm159_vm1, %v156_v34 }
 0x167   :  { %160 = vst.msk [vmem:[%s271_s5] sm:$0xff] %vm159_vm1, %v151_v36 }

</bundles_post_ra>
